<compile_context>
chip_gen: v7x
topology: tpu7x:2x2x1
jax: 0.10.0
libtpu: 0.0.40
codegen_flags: <defaults>
</compile_context>

<pallas_src>
import functools

import jax
import jax.numpy as jnp
from jax import lax
from jax.experimental import pallas as pl
from jax.experimental.pallas import tpu as pltpu

LANE = 128


def _masked_bce_kernel(x_ref, t_ref, sum_ref, cnt_ref, *,
                       ignore_value, full_rows, rem_lanes):
    """One (block_rows, 128) tile -> (8, 128) partial loss-sum and mask-count."""
    i = pl.program_id(0)

    x = x_ref[...].astype(jnp.float32)
    t = t_ref[...].astype(jnp.float32)
    br, lanes = x.shape

    # Validity of each element within the original flat array (handles wrapper
    # alignment padding and the out-of-bounds rows of a ragged last block).
    row = i * br + lax.broadcasted_iota(jnp.int32, x.shape, 0)
    lane = lax.broadcasted_iota(jnp.int32, x.shape, 1)
    in_bounds = (row < full_rows) | ((row == full_rows) & (lane < rem_lanes))

    mask = (t != jnp.float32(ignore_value)) & in_bounds

    # torch.nn.BCELoss clamps the log terms at -100.
    log_x = jnp.maximum(jnp.log(x), -100.0)
    log_1mx = jnp.maximum(jnp.log(1.0 - x), -100.0)
    loss = -(t * log_x + (1.0 - t) * log_1mx)
    loss = jnp.where(mask, loss, 0.0)          # select: garbage/NaN never leaks
    ones = jnp.where(mask, 1.0, 0.0)

    # Reduce (br, 128) -> (8, 128): tile-aligned sublane-group sum, pure VPU.
    nb = br // 8
    sum_ref[...] = jnp.sum(loss.reshape(nb, 8, lanes), axis=0)
    cnt_ref[...] = jnp.sum(ones.reshape(nb, 8, lanes), axis=0)


def masked_loss(inp, target, ignore_value=-1.0, *, block_rows=2048):
    """Pallas equivalent of MaskedLoss.forward(input, target) -> scalar f32."""
    assert inp.shape == target.shape, (inp.shape, target.shape)

    x = inp.reshape(-1)      # no copy for contiguous inputs; dtype preserved
    t = target.reshape(-1)
    n = int(x.size)

    # Minimum sublane alignment for the narrower of the two dtypes
    # (f32 -> 8, bf16/f16 -> 16, int8/fp8 -> 32).
    min_item = min(int(jnp.dtype(x.dtype).itemsize),
                   int(jnp.dtype(t.dtype).itemsize))
    sub = 8 * max(1, 4 // max(min_item, 1))

    rows = pl.cdiv(max(n, 1), LANE)
    rows = pl.cdiv(rows, sub) * sub
    padded_n = rows * LANE
    if padded_n != n:
        # Only copy when not already tile-aligned; pad values are irrelevant
        # (masked in-kernel by the element-count check).
        x = jnp.pad(x, (0, padded_n - n))
        t = jnp.pad(t, (0, padded_n - n))
    x = x.reshape(rows, LANE)
    t = t.reshape(rows, LANE)

    # Large, VMEM-friendly tiles: multiple of 32 sublanes (covers f32/bf16/int8
    # tile shapes), clamped to the whole array for small inputs.  Default 2048
    # rows = 1 MiB/f32 buffer -> 2 in x 2 buf = 4 MiB, well inside the 32 MiB
    # scoped-VMEM default on all of v5e/v6e/v7x.
    br = max(32, (int(block_rows) // 32) * 32)
    if br >= rows:
        br = rows                               # single full-array block
    num_blocks = pl.cdiv(rows, br)              # last block may be ragged

    kernel = functools.partial(
        _masked_bce_kernel,
        ignore_value=float(ignore_value),
        full_rows=n // LANE,
        rem_lanes=n % LANE,
    )

    bytes_accessed = n * (int(jnp.dtype(x.dtype).itemsize) +
                          int(jnp.dtype(t.dtype).itemsize))
    bytes_accessed += num_blocks * 8 * LANE * 4 * 2
    cost = pl.CostEstimate(
        flops=6 * max(n, 1),
        transcendentals=2 * max(n, 1),
        bytes_accessed=int(bytes_accessed),
    )

    sum_p, cnt_p = pl.pallas_call(
        kernel,
        out_shape=(
            jax.ShapeDtypeStruct((num_blocks * 8, LANE), jnp.float32),
            jax.ShapeDtypeStruct((num_blocks * 8, LANE), jnp.float32),
        ),
        grid_spec=pltpu.PrefetchScalarGridSpec(
            num_scalar_prefetch=0,
            grid=(num_blocks,),
            in_specs=[
                pl.BlockSpec((br, LANE), lambda i: (i, 0)),
                pl.BlockSpec((br, LANE), lambda i: (i, 0)),
            ],
            out_specs=[
                pl.BlockSpec((8, LANE), lambda i: (i, 0)),
                pl.BlockSpec((8, LANE), lambda i: (i, 0)),
            ],
        ),
        compiler_params=pltpu.CompilerParams(
            dimension_semantics=("parallel",)),
        cost_estimate=cost,
    )(x, t)

    s = jnp.sum(sum_p)
    c = jnp.sum(cnt_p)
    # torch: return loss.mean() if loss.numel() > 0 else 0.0
    return jnp.where(c > 0, s / jnp.maximum(c, 1.0), jnp.float32(0.0))


def _reference(inp, target, ignore_value=-1.0):
    x = inp.astype(jnp.float32)
    t = target.astype(jnp.float32)
    mask = t != ignore_value
    log_x = jnp.maximum(jnp.log(x), -100.0)
    log_1mx = jnp.maximum(jnp.log(1.0 - x), -100.0)
    loss = -(t * log_x + (1.0 - t) * log_1mx)
    loss = jnp.where(mask, loss, 0.0)
    cnt = jnp.sum(mask)
    return jnp.where(cnt > 0, jnp.sum(loss) / jnp.maximum(cnt, 1), 0.0)


if __name__ == "__main__":
    key = jax.random.PRNGKey(0)
    k1, k2, k3 = jax.random.split(key, 3)

    # Small shapes consistent with a multi-label head: (batch=2, ch=4, 16, 16).
    shape = (2, 4, 16, 16)
    inp = jax.random.uniform(k1, shape, jnp.float32, minval=0.01, maxval=0.99)
    tgt = (jax.random.uniform(k2, shape, jnp.float32) > 0.5).astype(jnp.float32)
    ignore_mask = jax.random.uniform(k3, shape, jnp.float32) < 0.3
    tgt = jnp.where(ignore_mask, jnp.float32(-1.0), tgt)

    out = jax.block_until_ready(masked_loss(inp, tgt, ignore_value=-1.0))
    ref = _reference(inp, tgt, ignore_value=-1.0)
    assert jnp.allclose(out, ref, rtol=1e-5, atol=1e-6), (out, ref)

    # Edge case: everything ignored -> 0.0
    tgt_all_ignored = jnp.full(shape, -1.0, jnp.float32)
    out0 = jax.block_until_ready(masked_loss(inp, tgt_all_ignored))
    assert jnp.allclose(out0, 0.0), out0

    # bf16 inputs, non-aligned size, multi-block grid with a ragged last block.
    shape2 = (2, 4, 40, 40)
    i2 = jax.random.uniform(k1, shape2, jnp.float32,
                            minval=0.01, maxval=0.99).astype(jnp.bfloat16)
    t2 = (jax.random.uniform(k2, shape2, jnp.float32) > 0.5).astype(jnp.float32)
    t2 = jnp.where(jax.random.uniform(k3, shape2, jnp.float32) < 0.25,
                   -1.0, t2).astype(jnp.bfloat16)
    out2 = jax.block_until_ready(masked_loss(i2, t2, block_rows=32))
    ref2 = _reference(i2, t2)
    assert jnp.allclose(out2, ref2, rtol=2e-4, atol=1e-5), (out2, ref2)

    print("KERNEL_OK")
</pallas_src>

<mosaic_0001>
module attributes {stable_mosaic.version = 11 : i64} {
  func.func @_masked_bce_kernel(%arg0: i32, %arg1: memref<16x128xf32, #tpu.memory_space<vmem>>, %arg2: memref<16x128xf32, #tpu.memory_space<vmem>>, %arg3: memref<8x128xf32, #tpu.memory_space<vmem>>, %arg4: memref<8x128xf32, #tpu.memory_space<vmem>>) attributes {dimension_semantics = [#tpu.dimension_semantics<parallel>], iteration_bounds = array<i64: 1>, scalar_prefetch = 0 : i64, scratch_operands = 0 : i64, tpu.core_type = #tpu.core_type<tc>, window_params = [{transform_indices = @transform_0, window_bounds = array<i64: 16, 128>}, {transform_indices = @transform_1, window_bounds = array<i64: 16, 128>}, {transform_indices = @transform_2, window_bounds = array<i64: 8, 128>}, {transform_indices = @transform_3, window_bounds = array<i64: 8, 128>}]} {
    %c0 = arith.constant 0 : index
    %c0_0 = arith.constant 0 : index
    %0 = vector.load %arg1[%c0, %c0_0] : memref<16x128xf32, #tpu.memory_space<vmem>>, vector<16x128xf32>
    %c0_1 = arith.constant 0 : index
    %c0_2 = arith.constant 0 : index
    %1 = vector.load %arg2[%c0_1, %c0_2] : memref<16x128xf32, #tpu.memory_space<vmem>>, vector<16x128xf32>
    %c16_i32 = arith.constant 16 : i32
    %2 = arith.muli %arg0, %c16_i32 : i32
    %3 = tpu.iota {dimensions = array<i32: 0>} : vector<16x128xi32>
    %4 = vector.broadcast %2 : i32 to vector<16x128xi32>
    %5 = arith.addi %4, %3 : vector<16x128xi32>
    %6 = tpu.iota {dimensions = array<i32: 1>} : vector<16x128xi32>
    %c16_i32_3 = arith.constant 16 : i32
    %7 = vector.broadcast %c16_i32_3 : i32 to vector<16x128xi32>
    %8 = arith.cmpi slt, %5, %7 : vector<16x128xi32>
    %c16_i32_4 = arith.constant 16 : i32
    %9 = vector.broadcast %c16_i32_4 : i32 to vector<16x128xi32>
    %10 = arith.cmpi eq, %5, %9 : vector<16x128xi32>
    %c0_i32 = arith.constant 0 : i32
    %11 = vector.broadcast %c0_i32 : i32 to vector<16x128xi32>
    %12 = arith.cmpi slt, %6, %11 : vector<16x128xi32>
    %13 = arith.andi %10, %12 : vector<16x128xi1>
    %14 = arith.ori %8, %13 : vector<16x128xi1>
    %cst = arith.constant -1.000000e+00 : f32
    %15 = vector.broadcast %cst : f32 to vector<16x128xf32>
    %16 = arith.cmpf one, %1, %15 : vector<16x128xf32>
    %17 = arith.andi %16, %14 : vector<16x128xi1>
    %18 = math.log %0 : vector<16x128xf32>
    %cst_5 = arith.constant -1.000000e+02 : f32
    %19 = vector.broadcast %cst_5 : f32 to vector<16x128xf32>
    %20 = arith.maximumf %18, %19 : vector<16x128xf32>
    %cst_6 = arith.constant 1.000000e+00 : f32
    %21 = vector.broadcast %cst_6 : f32 to vector<16x128xf32>
    %22 = arith.subf %21, %0 : vector<16x128xf32>
    %23 = math.log %22 : vector<16x128xf32>
    %cst_7 = arith.constant -1.000000e+02 : f32
    %24 = vector.broadcast %cst_7 : f32 to vector<16x128xf32>
    %25 = arith.maximumf %23, %24 : vector<16x128xf32>
    %26 = arith.mulf %1, %20 : vector<16x128xf32>
    %cst_8 = arith.constant 1.000000e+00 : f32
    %27 = vector.broadcast %cst_8 : f32 to vector<16x128xf32>
    %28 = arith.subf %27, %1 : vector<16x128xf32>
    %29 = arith.mulf %28, %25 : vector<16x128xf32>
    %30 = arith.addf %26, %29 : vector<16x128xf32>
    %cst_9 = arith.constant 0.000000e+00 : f32
    %31 = vector.broadcast %cst_9 : f32 to vector<16x128xf32>
    %32 = arith.subf %31, %30 : vector<16x128xf32>
    %cst_10 = arith.constant 0.000000e+00 : f32
    %33 = vector.broadcast %cst_10 : f32 to vector<16x128xf32>
    %34 = arith.select %17, %32, %33 : vector<16x128xi1>, vector<16x128xf32>
    %cst_11 = arith.constant 1.000000e+00 : f32
    %cst_12 = arith.constant 0.000000e+00 : f32
    %35 = vector.broadcast %cst_11 : f32 to vector<16x128xf32>
    %36 = vector.broadcast %cst_12 : f32 to vector<16x128xf32>
    %37 = arith.select %17, %35, %36 : vector<16x128xi1>, vector<16x128xf32>
    %38 = vector.shape_cast %34 : vector<16x128xf32> to vector<2x8x128xf32>
    %cst_13 = arith.constant dense<0.000000e+00> : vector<8x128xf32>
    %39 = vector.multi_reduction <add>, %38, %cst_13 [0] : vector<2x8x128xf32> to vector<8x128xf32>
    %c0_14 = arith.constant 0 : index
    %c0_15 = arith.constant 0 : index
    %40 = vector.load %arg3[%c0_14, %c0_15] : memref<8x128xf32, #tpu.memory_space<vmem>>, vector<8x128xf32>
    tpu.vector_store %arg3[%c0_14, %c0_15], %39 {strides = array<i32>} : memref<8x128xf32, #tpu.memory_space<vmem>>, vector<8x128xf32>,
    %41 = vector.shape_cast %37 : vector<16x128xf32> to vector<2x8x128xf32>
    %cst_16 = arith.constant dense<0.000000e+00> : vector<8x128xf32>
    %42 = vector.multi_reduction <add>, %41, %cst_16 [0] : vector<2x8x128xf32> to vector<8x128xf32>
    %c0_17 = arith.constant 0 : index
    %c0_18 = arith.constant 0 : index
    %43 = vector.load %arg4[%c0_17, %c0_18] : memref<8x128xf32, #tpu.memory_space<vmem>>, vector<8x128xf32>
    tpu.vector_store %arg4[%c0_17, %c0_18], %42 {strides = array<i32>} : memref<8x128xf32, #tpu.memory_space<vmem>>, vector<8x128xf32>,
    return
  }
  func.func @transform_0(%arg0: i32) -> (i32, i32) {
    %c0_i32 = arith.constant 0 : i32
    %c0_i32_0 = arith.constant 0 : i32
    return %arg0, %c0_i32 : i32, i32
  }
  func.func @transform_1(%arg0: i32) -> (i32, i32) {
    %c0_i32 = arith.constant 0 : i32
    %c0_i32_0 = arith.constant 0 : i32
    return %arg0, %c0_i32 : i32, i32
  }
  func.func @transform_2(%arg0: i32) -> (i32, i32) {
    %c0_i32 = arith.constant 0 : i32
    %c0_i32_0 = arith.constant 0 : i32
    return %arg0, %c0_i32 : i32, i32
  }
  func.func @transform_3(%arg0: i32) -> (i32, i32) {
    %c0_i32 = arith.constant 0 : i32
    %c0_i32_0 = arith.constant 0 : i32
    return %arg0, %c0_i32 : i32, i32
  }
}

</mosaic_0001>

<bundles_post_ra>
// kernel: tpu_custom_call.1
= control target key start
LH: loop header
LB: loop body
LE: loop exit
PB: predicated region body
PF: predicated region fallthrough
CT: control target
= control target key end

     0   :  { %9 = vsyncpa [#allocation3], 0  ;;  %s321_s0 = inlined_call_operand.hbm [shape: f32[16,128], index: 0, kind: input, shape index: {}]   ;;  %s322_s1 = inlined_call_operand.hbm [shape: f32[16,128], index: 1, kind: input, shape index: {}]   ;;  %s323_s2 = inlined_call_operand.hbm [shape: f32[8,128], index: 2, kind: output, shape index: {0}]   ;;  %s324_s3 = inlined_call_operand.hbm [shape: f32[8,128], index: 3, kind: output, shape index: {1}]  }
   0x1   :  { %10 = vsyncpa [#allocation6], 0 }
   0x2   :  { %11 = vsyncpa [#allocation4], 0 }
   0x3   :  { %12 = vsyncpa [#allocation9], 0  ;;  %s242_s12 = smov [#allocation2]   ;;  %s146_s16 = scalar_lea.hbm %s321_s0, 256 }
   0x4   :  { %s18_s13 = sshll.u32 %s242_s12, 4  ;;  %p147_p0 = scmp.ne.s32.totalorder %s321_s0, %s146_s16  ;;  %s19_s13 = int_to_ptr.vmem [resolvable:$true] %s18_s13 }
   0x5   :  { %p150_p1 = scmp.lt.u32.totalorder %s146_s16, %s321_s0 }
   0x7   :  { %p152_p2 = pnand %p150_p1, %p147_p0 }
   0x9   :  { %155 = shalt.err (!%p152_p2)
}
   0xa   :  { %s156_s21 = scalar_lea.vmem %s19_s13, 256  ;;  %p161_p4 = scmp.lt.s32.totalorder %s19_s13, %s19_s13 }
   0xb   :  { %p157_p3 = scmp.ne.s32.totalorder %s19_s13, %s156_s21  ;;  %p162_p5 = scmp.lt.s32.totalorder %s156_s21, %s156_s21 }
   0xd   :  { %p163_p6 = por %p162_p5, %p161_p4 }
   0xf   :  { %p164_p7 = pnand %p163_p6, %p157_p3 }
  0x11   :  { %167 = shalt.err (!%p164_p7)
}
  0x12   :  { %s243_s22 = smov 128   ;;  %s244_s23 = smov 8  }
  0x13   :  { %24 = dma.hbm_to_vmem [thread:$0]  %s321_s0, 256, %s19_s13, [#allocation3], %s243_s22, %s243_s22, %s244_s23  }
  0x14   :  { %s245_s26 = smov [#allocation5]   ;;  %s168_s30 = scalar_lea.hbm %s322_s1, 256 }
  0x15   :  { %s30_s27 = sshll.u32 %s245_s26, 4  ;;  %p169_p8 = scmp.ne.s32.totalorder %s322_s1, %s168_s30  ;;  %s31_s27 = int_to_ptr.vmem [resolvable:$true] %s30_s27 }
  0x16   :  { %p172_p9 = scmp.lt.u32.totalorder %s168_s30, %s322_s1 }
  0x18   :  { %p174_p10 = pnand %p172_p9, %p169_p8 }
  0x1a   :  { %177 = shalt.err (!%p174_p10)
}
  0x1b   :  { %s178_s8 = scalar_lea.vmem %s31_s27, 256  ;;  %p183_p12 = scmp.lt.s32.totalorder %s31_s27, %s31_s27 }
  0x1c   :  { %p179_p11 = scmp.ne.s32.totalorder %s31_s27, %s178_s8  ;;  %p184_p13 = scmp.lt.s32.totalorder %s178_s8, %s178_s8 }
  0x1e   :  { %p185_p0 = por %p184_p13, %p183_p12 }
  0x20   :  { %p186_p1 = pnand %p185_p0, %p179_p11 }
  0x22   :  { %189 = shalt.err (!%p186_p1)
}
  0x23   :  { %36 = dma.hbm_to_vmem [thread:$0]  %s322_s1, 256, %s31_s27, [#allocation6], %s243_s22, %s243_s22, %s244_s23  }
  0x24   :  { %234 = dma.done.wait [#allocation3], 256  }
  0x25   :  { %235 = vsyncadd [#allocation3], 4294967040 }
  0x26   :  { %236 = dma.done.wait [#allocation6], 256  }
  0x27   :  { %237 = vsyncadd [#allocation6], 4294967040  ;;  %v43_v0 = vld [vmem:[#allocation2] sm:$0xff]  ;;  %v44_v1 = vld [vmem:[#allocation2 + $0x8] sm:$0xff]  ;;  %s246_s10 = smov [#allocation8]   ;;  %v247_v6 = vmov 0.0  }
  0x28   :  { %v45_v2 = vld [vmem:[#allocation5] sm:$0xff]  ;;  %v46_v3 = vld [vmem:[#allocation5 + $0x8] sm:$0xff]  ;;  %138 = vlog2.f32 %v43_v0  ;;  %v75_v4 = vsub.f32 1.0, %v43_v0  ;;  %v76_v5 = vsub.f32 1.0, %v44_v1  ;;  %s117_s11 = sshll.u32 %s246_s10, 4  ;;  %s118_s11 = int_to_ptr.vmem [resolvable:$true] %s117_s11 }
  0x29   :  { %vm65_vm0 = vcmp.ne.f32.partialorder %v45_v2, -1.0  ;;  %vm66_vm1 = vcmp.ne.f32.partialorder %v46_v3, -1.0  ;;  %140 = vlog2.f32 %v44_v1  ;;  %s190_s1 = scalar_lea.vmem %s118_s11, 128  ;;  %p195_p3 = scmp.lt.s32.totalorder %s118_s11, %s118_s11 }
  0x2a   :  { %142 = vlog2.f32 %v75_v4  ;;  %v95_v7 = vsel %vm65_vm0, 1.0, %v247_v6  ;;  %v96_v8 = vsel %vm66_vm1, 1.0, %v247_v6  ;;  %p191_p2 = scmp.ne.s32.totalorder %s118_s11, %s190_s1  ;;  %p196_p4 = scmp.lt.s32.totalorder %s190_s1, %s190_s1 }
  0x2b   :  { %144 = vlog2.f32 %v76_v5  ;;  %v99_v9 = vadd.f32 %v96_v8, %v95_v7 }
  0x2c   :  { %p197_p5 = por %p196_p4, %p195_p3 }
  0x2d   :  { %100 = vst [vmem:[#allocation8] sm:$0xff] %v99_v9 }
  0x2e   :  { %p198_p6 = pnand %p197_p5, %p191_p2 }
  0x30   :  { %201 = shalt.err (!%p198_p6)
}
  0x31   :  { %s202_s14 = scalar_lea.hbm %s324_s3, 128 }
  0x32   :  { %p203_p7 = scmp.ne.s32.totalorder %s324_s3, %s202_s14  ;;  %p206_p8 = scmp.lt.u32.totalorder %s202_s14, %s324_s3 }
  0x34   :  { %p208_p9 = pnand %p206_p8, %p203_p7 }
  0x36   :  { %211 = shalt.err (!%p208_p9)
}
  0x37   :  { %120 = dma.vmem_to_hbm [thread:$0]  %s118_s11, 128, %s324_s3, [#allocation9]   ;;  %v139_v10 = vpop.eup %138  ;;  %v85_v18 = vsub.f32 1.0, %v45_v2  ;;  %v86_v21 = vsub.f32 1.0, %v46_v3 }
  0x38   :  { %v141_v11 = vpop.eup %140  ;;  %v70_v12 = vmul.f32 0.6931472, %v139_v10  ;;  %s248_s3 = smov [#allocation7]  }
  0x39   :  { %v143_v13 = vpop.eup %142  ;;  %v72_v14 = vmul.f32 0.6931472, %v141_v11  ;;  %s107_s21 = sshll.u32 %s248_s3, 4  ;;  %s108_s21 = int_to_ptr.vmem [resolvable:$true] %s107_s21 }
  0x3a   :  { %v145_v15 = vpop.eup %144  ;;  %v73_v16 = vmax.f32 %v70_v12, -100.0  ;;  %v78_v17 = vmul.f32 0.6931472, %v143_v13  ;;  %s212_s22 = scalar_lea.vmem %s108_s21, 128  ;;  %p217_p11 = scmp.lt.s32.totalorder %s108_s21, %s108_s21 }
  0x3b   :  { %v74_v19 = vmax.f32 %v72_v14, -100.0  ;;  %v80_v20 = vmul.f32 0.6931472, %v145_v15  ;;  %p213_p10 = scmp.ne.s32.totalorder %s108_s21, %s212_s22  ;;  %p218_p12 = scmp.lt.s32.totalorder %s212_s22, %s212_s22 }
  0x3c   :  { %v81_v22 = vmax.f32 %v78_v17, -100.0  ;;  %v83_v23 = vmul.f32 %v73_v16, %v45_v2 }
  0x3d   :  { %v82_v24 = vmax.f32 %v80_v20, -100.0  ;;  %v84_v25 = vmul.f32 %v74_v19, %v46_v3  ;;  %p219_p13 = por %p218_p12, %p217_p11 }
  0x3e   :  { %v87_v26 = vmul.f32 %v85_v18, %v81_v22 }
  0x3f   :  { %v88_v27 = vmul.f32 %v86_v21, %v82_v24  ;;  %p220_p0 = pnand %p219_p13, %p213_p10 }
  0x40   :  { %v89_v28 = vadd.f32 %v87_v26, %v83_v23 }
  0x41   :  { %v90_v29 = vadd.f32 %v88_v27, %v84_v25 }
  0x42   :  { %v91_v30 = vsub.f32 0.0, %v89_v28 }
  0x43   :  { %v92_v31 = vsub.f32 0.0, %v90_v29 }
  0x44   :  { %v93_v32 = vsel %vm65_vm0, %v91_v30, 0.0 }
  0x45   :  { %v94_v33 = vsel %vm66_vm1, %v92_v31, 0.0 }
  0x46   :  { %v97_v34 = vadd.f32 %v94_v33, %v93_v32 }
  0x48   :  { %98 = vst [vmem:[#allocation7] sm:$0xff] %v97_v34 }
  0x49   :  { %223 = shalt.err (!%p220_p0)
}
  0x4a   :  { %s224_s25 = scalar_lea.hbm %s323_s2, 128 }
  0x4b   :  { %p225_p1 = scmp.ne.s32.totalorder %s323_s2, %s224_s25  ;;  %p228_p2 = scmp.lt.u32.totalorder %s224_s25, %s323_s2 }
  0x4d   :  { %p230_p3 = pnand %p228_p2, %p225_p1 }
  0x4f   :  { %233 = shalt.err (!%p230_p3)
}
  0x50   :  { %110 = dma.vmem_to_hbm [thread:$0]  %s108_s21, 128, %s323_s2, [#allocation4]  }
  0x51   :  { %238 = dma.done.wait [#allocation4], 128  }
  0x52   :  { %239 = vsyncadd [#allocation4], 4294967168 }
  0x53   :  { %240 = dma.done.wait [#allocation9], 128  }
  0x54   :  { %241 = vsyncadd [#allocation9], 4294967168 }
  0x55   :  { %127 = vsyncpa [#allocation3], 1 }
  0x56   :  { %128 = vsyncpa [#allocation6], 1 }
  0x57   :  { %129 = vsyncpa [#allocation4], 1 }
  0x58   :  { %130 = vsyncpa [#allocation9], 1 }

</bundles_post_ra>
